<compile_context>
chip_gen: v7x
topology: tpu7x:2x2x1
jax: 0.10.0
libtpu: 0.0.40
codegen_flags: <defaults>
</compile_context>

<pallas_src>
import math
from functools import partial

import jax
import jax.numpy as jnp
from jax.experimental import pallas as pl
from jax.experimental.pallas import tpu as pltpu


# -----------------------------------------------------------------------------
# Helpers
# -----------------------------------------------------------------------------
def _round_up(x, m):
    return (x + m - 1) // m * m


def _vmem_limit_bytes():
    """75% of this chip's VMEM, capped at 96 MiB (v5e/v6e: 96 MiB, v7x: 48 MiB)."""
    cap = 128 * 1024 * 1024
    try:
        info = pltpu.get_tpu_info()
        cap = int(getattr(info, "vmem_capacity_bytes", cap))
    except Exception:
        pass
    return min(int(cap * 3 // 4), 96 * 1024 * 1024)


def _batch_tiling(B, target=128):
    """(padded batch, batch tile, num batch grid steps); >=2 steps when B >= 16."""
    if B >= 16:
        half = (B + 1) // 2
        tb = min(target, _round_up(half, 8))
    else:
        tb = B
    B_pad = _round_up(B, tb)
    return B_pad, tb, B_pad // tb


def _seq_tiling(S, per_s_bytes, budget_bytes, align):
    """(padded seq, seq tile, num seq grid steps) given a VMEM byte budget."""
    cap = max(align, (budget_bytes // max(per_s_bytes, 1)) // align * align)
    if S <= cap:
        return S, S, 1              # whole (unpadded) S in one block
    ts = cap
    S_pad = _round_up(S, ts)
    return S_pad, ts, S_pad // ts


# -----------------------------------------------------------------------------
# Kernels
# -----------------------------------------------------------------------------
def _scores_kernel(q_ref, wqk_ref, k_ref, o_ref, *, inv_sqrt_h, use_tanh, C):
    # q_ref   : (TB, H)      queries (f32)
    # wqk_ref : (H, H)       folded Wq^T @ Wk (f32)
    # k_ref   : (TB, TS, H)  raw keys (compute dtype, upcast here)
    # o_ref   : (TB, TS)     attention logits (f32)
    q = q_ref[...].astype(jnp.float32)
    k = k_ref[...].astype(jnp.float32)

    qeff = jnp.dot(q, wqk_ref[...], preferred_element_type=jnp.float32)        # (TB, H)
    scores = jnp.sum(qeff[:, None, :] * k, axis=-1) * inv_sqrt_h               # (TB, TS)
    if use_tanh:
        scores = C * jnp.tanh(scores)
    o_ref[...] = scores.astype(o_ref.dtype)


def _attn_out_kernel(q_ref, wqk_ref, wv_ref, k_ref, v_ref, o_ref,
                     m_sc, l_sc, acc_sc, *, inv_sqrt_h, s_valid, ts, needs_mask):
    # return_attention=False path: flash-style online softmax over S tiles.
    s_idx = pl.program_id(1)

    @pl.when(s_idx == 0)
    def _():
        m_sc[...] = jnp.full_like(m_sc, -jnp.inf)
        l_sc[...] = jnp.zeros_like(l_sc)
        acc_sc[...] = jnp.zeros_like(acc_sc)

    q = q_ref[...].astype(jnp.float32)        # (TB, H)
    k = k_ref[...].astype(jnp.float32)        # (TB, TS, H)
    v = v_ref[...].astype(jnp.float32)        # (TB, TS, H)

    qeff = jnp.dot(q, wqk_ref[...], preferred_element_type=jnp.float32)        # (TB, H)
    scores = jnp.sum(qeff[:, None, :] * k, axis=-1) * inv_sqrt_h               # (TB, TS)

    if needs_mask:  # padded S positions must not contribute to the softmax
        pos = s_idx * ts + jax.lax.broadcasted_iota(jnp.int32, scores.shape, 1)
        scores = jnp.where(pos < s_valid, scores, -jnp.inf)

    m_prev = m_sc[...]
    m_new = jnp.maximum(m_prev, jnp.max(scores, axis=-1, keepdims=True))       # (TB, 1)
    alpha = jnp.exp(m_prev - m_new)                                            # (TB, 1)
    p = jnp.exp(scores - m_new)                                                # (TB, TS)
    l_sc[...] = alpha * l_sc[...] + jnp.sum(p, axis=-1, keepdims=True)
    acc_sc[...] = alpha * acc_sc[...] + jnp.sum(p[:, :, None] * v, axis=1)     # (TB, H)
    m_sc[...] = m_new

    @pl.when(s_idx == pl.num_programs(1) - 1)
    def _():
        ctx = acc_sc[...] / l_sc[...]                                          # exact div
        out = jnp.dot(ctx, wv_ref[...], preferred_element_type=jnp.float32)    # (TB, H)
        o_ref[...] = out.astype(o_ref.dtype)


# -----------------------------------------------------------------------------
# Wrappers
# -----------------------------------------------------------------------------
def attention_scores(query, key, wq, wk, *, use_tanh=True, C=10.0,
                     compute_dtype=jnp.bfloat16, batch_tile=128):
    """return_attention=True forward: logits [B, S]."""
    B, S, H = key.shape
    B_pad, TB, nb = _batch_tiling(B, batch_tile)

    itemsize = jnp.dtype(compute_dtype).itemsize
    vmem_limit = _vmem_limit_bytes()
    # double-buffered K block + f32 output block, per S element
    per_s = 2 * TB * H * itemsize + 2 * TB * 4
    S_pad, TS, ns = _seq_tiling(S, per_s, vmem_limit // 2, 128)

    if B_pad != B or S_pad != S:
        query = jnp.pad(query, ((0, B_pad - B), (0, 0)))
        key = jnp.pad(key, ((0, B_pad - B), (0, S_pad - S), (0, 0)))

    # Fold Wk into the query: (q Wq^T)(k Wk^T)^T = (q (Wq^T Wk)) k^T.
    wqk = (wq.T @ wk).astype(jnp.float32)
    query = query.astype(jnp.float32)
    key = key.astype(compute_dtype)

    kern = partial(_scores_kernel, inv_sqrt_h=1.0 / math.sqrt(H),
                   use_tanh=use_tanh, C=float(C))
    out = pl.pallas_call(
        kern,
        out_shape=jax.ShapeDtypeStruct((B_pad, S_pad), jnp.float32),
        grid_spec=pltpu.PrefetchScalarGridSpec(
            num_scalar_prefetch=0,
            grid=(nb, ns),
            in_specs=[
                pl.BlockSpec((TB, H), lambda b, s: (b, 0)),
                pl.BlockSpec((H, H), lambda b, s: (0, 0)),       # constant block
                pl.BlockSpec((TB, TS, H), lambda b, s: (b, s, 0)),
            ],
            out_specs=pl.BlockSpec((TB, TS), lambda b, s: (b, s)),
        ),
        compiler_params=pltpu.CompilerParams(
            dimension_semantics=("parallel", "parallel"),
            vmem_limit_bytes=vmem_limit,
        ),
    )(query, wqk, key)
    return out[:B, :S]


def attention_output(query, key, value, wq, wk, wv, *,
                     compute_dtype=jnp.bfloat16, batch_tile=128):
    """return_attention=False forward: attention output [B, H]."""
    B, S, H = key.shape
    B_pad, TB, nb = _batch_tiling(B, batch_tile)

    itemsize = jnp.dtype(compute_dtype).itemsize
    vmem_limit = _vmem_limit_bytes()
    per_s = 2 * 2 * TB * H * itemsize            # K and V, double-buffered
    S_pad, TS, ns = _seq_tiling(S, per_s, vmem_limit // 2, 8)

    if B_pad != B or S_pad != S:
        query = jnp.pad(query, ((0, B_pad - B), (0, 0)))
        key = jnp.pad(key, ((0, B_pad - B), (0, S_pad - S), (0, 0)))
        value = jnp.pad(value, ((0, B_pad - B), (0, S_pad - S), (0, 0)))

    wqk = (wq.T @ wk).astype(jnp.float32)        # folded q/k projection
    wv_t = wv.T.astype(jnp.float32)              # V projected after the mix
    query = query.astype(jnp.float32)
    key = key.astype(compute_dtype)
    value = value.astype(compute_dtype)

    kern = partial(_attn_out_kernel, inv_sqrt_h=1.0 / math.sqrt(H),
                   s_valid=S, ts=TS, needs_mask=(S_pad != S))
    out = pl.pallas_call(
        kern,
        out_shape=jax.ShapeDtypeStruct((B_pad, H), jnp.float32),
        grid_spec=pltpu.PrefetchScalarGridSpec(
            num_scalar_prefetch=0,
            grid=(nb, ns),
            in_specs=[
                pl.BlockSpec((TB, H), lambda b, s: (b, 0)),
                pl.BlockSpec((H, H), lambda b, s: (0, 0)),
                pl.BlockSpec((H, H), lambda b, s: (0, 0)),
                pl.BlockSpec((TB, TS, H), lambda b, s: (b, s, 0)),
                pl.BlockSpec((TB, TS, H), lambda b, s: (b, s, 0)),
            ],
            out_specs=pl.BlockSpec((TB, H), lambda b, s: (b, 0)),
            scratch_shapes=[
                pltpu.VMEM((TB, 1), jnp.float32),    # running max
                pltpu.VMEM((TB, 1), jnp.float32),    # running sum
                pltpu.VMEM((TB, H), jnp.float32),    # running context acc
            ],
        ),
        compiler_params=pltpu.CompilerParams(
            dimension_semantics=("parallel", "arbitrary"),
            vmem_limit_bytes=vmem_limit,
        ),
    )(query, wqk, wv_t, key, value)
    return out[:B]


# -----------------------------------------------------------------------------
# Pure-JAX reference (mirrors the PyTorch forward exactly)
# -----------------------------------------------------------------------------
def ref_scores(query, key, wq, wk, use_tanh=True, C=10.0):
    H = key.shape[-1]
    q = (query @ wq.T)[:, None, :]                 # (B, 1, H)
    k = key @ wk.T                                 # (B, S, H)
    s = jnp.einsum("bqh,bsh->bqs", q, k) / math.sqrt(H)
    if use_tanh:
        s = C * jnp.tanh(s)
    return s[:, 0, :]


def ref_output(query, key, value, wq, wk, wv):
    H = key.shape[-1]
    q = (query @ wq.T)[:, None, :]
    k = key @ wk.T
    v = value @ wv.T
    s = jnp.einsum("bqh,bsh->bqs", q, k) / math.sqrt(H)
    p = jax.nn.softmax(s, axis=-1)
    return jnp.einsum("bqs,bsh->bqh", p, v)[:, 0, :]


# -----------------------------------------------------------------------------
# Main
# -----------------------------------------------------------------------------
if __name__ == "__main__":
    B, S, H = 2, 8, 32   # batch, seq_len, hidden_dim
    C = 10.0

    key0 = jax.random.PRNGKey(0)
    k_q, k_k, k_wq, k_wk, k_wv = jax.random.split(key0, 5)

    query = jax.random.normal(k_q, (B, H), dtype=jnp.float32)
    key_t = jax.random.normal(k_k, (B, S, H), dtype=jnp.float32)

    # deterministic Linear weights (PyTorch [out, in] layout, kaiming-uniform-ish bound)
    bound = 1.0 / math.sqrt(H)
    wq = jax.random.uniform(k_wq, (H, H), jnp.float32, -bound, bound)
    wk = jax.random.uniform(k_wk, (H, H), jnp.float32, -bound, bound)
    wv = jax.random.uniform(k_wv, (H, H), jnp.float32, -bound, bound)

    ref_s = ref_scores(query, key_t, wq, wk, use_tanh=True, C=C)
    ref_o = ref_output(query, key_t, key_t, wq, wk, wv)

    # --- f32 K/V path (tight correctness check) -----------------------------
    scores = jax.block_until_ready(
        attention_scores(query, key_t, wq, wk, use_tanh=True, C=C,
                         compute_dtype=jnp.float32))
    out = jax.block_until_ready(
        attention_output(query, key_t, key_t, wq, wk, wv,   # value=None -> value=key
                         compute_dtype=jnp.float32))

    assert scores.shape == (B, S)
    assert out.shape == (B, H)
    assert jnp.allclose(scores, ref_s, atol=1e-4, rtol=1e-4)
    assert jnp.allclose(out, ref_o, atol=1e-4, rtol=1e-4)

    # --- default bf16 K/V transfer path (looser tolerance) ------------------
    scores_bf = jax.block_until_ready(
        attention_scores(query, key_t, wq, wk, use_tanh=True, C=C))
    out_bf = jax.block_until_ready(
        attention_output(query, key_t, key_t, wq, wk, wv))
    assert jnp.allclose(scores_bf, ref_s, atol=1e-1, rtol=5e-2)
    assert jnp.allclose(out_bf, ref_o, atol=1e-1, rtol=5e-2)

    print("KERNEL_OK")
</pallas_src>

<mosaic_0001>
module attributes {stable_mosaic.version = 11 : i64} {
  func.func @_scores_kernel(%arg0: i32, %arg1: i32, %arg2: memref<2x32xf32, #tpu.memory_space<vmem>>, %arg3: memref<32x32xf32, #tpu.memory_space<vmem>>, %arg4: memref<2x8x32xf32, #tpu.memory_space<vmem>>, %arg5: memref<2x8xf32, #tpu.memory_space<vmem>>) attributes {dimension_semantics = [#tpu.dimension_semantics<parallel>, #tpu.dimension_semantics<parallel>], iteration_bounds = array<i64: 1, 1>, scalar_prefetch = 0 : i64, scratch_operands = 0 : i64, tpu.core_type = #tpu.core_type<tc>, window_params = [{transform_indices = @transform_0, window_bounds = array<i64: 2, 32>}, {pipeline_mode = #tpu.pipeline_mode<synchronous>, transform_indices = @transform_1, window_bounds = array<i64: 32, 32>}, {transform_indices = @transform_2, window_bounds = array<i64: 2, 8, 32>}, {transform_indices = @transform_3, window_bounds = array<i64: 2, 8>}]} {
    %c0 = arith.constant 0 : index
    %c0_0 = arith.constant 0 : index
    %0 = vector.load %arg2[%c0, %c0_0] : memref<2x32xf32, #tpu.memory_space<vmem>>, vector<2x32xf32>
    %c0_1 = arith.constant 0 : index
    %c0_2 = arith.constant 0 : index
    %c0_3 = arith.constant 0 : index
    %1 = vector.load %arg4[%c0_1, %c0_2, %c0_3] : memref<2x8x32xf32, #tpu.memory_space<vmem>>, vector<2x8x32xf32>
    %c0_4 = arith.constant 0 : index
    %c0_5 = arith.constant 0 : index
    %2 = vector.load %arg3[%c0_4, %c0_5] : memref<32x32xf32, #tpu.memory_space<vmem>>, vector<32x32xf32>
    %cst = arith.constant dense<0.000000e+00> : vector<2x32xf32>
    %3 = tpu.matmul %0, %2, %cst {dimension_numbers = #tpu.dot_dimension_numbers<[1], [0], [0], [1], [0, 0, 1, 1], [], []>} : vector<2x32xf32>, vector<32x32xf32>, vector<2x32xf32> -> vector<2x32xf32>
    %4 = vector.shape_cast %3 : vector<2x32xf32> to vector<2x1x32xf32>
    %5 = vector.broadcast %4 : vector<2x1x32xf32> to vector<2x8x32xf32>
    %6 = arith.mulf %5, %1 : vector<2x8x32xf32>
    %cst_6 = arith.constant dense<0.000000e+00> : vector<2x8xf32>
    %7 = vector.multi_reduction <add>, %6, %cst_6 [2] : vector<2x8x32xf32> to vector<2x8xf32>
    %cst_7 = arith.constant 0.176776692 : f32
    %8 = vector.broadcast %cst_7 : f32 to vector<2x8xf32>
    %9 = arith.mulf %7, %8 : vector<2x8xf32>
    %10 = math.tanh %9 : vector<2x8xf32>
    %cst_8 = arith.constant 1.000000e+01 : f32
    %11 = vector.broadcast %cst_8 : f32 to vector<2x8xf32>
    %12 = arith.mulf %11, %10 : vector<2x8xf32>
    %c0_9 = arith.constant 0 : index
    %c0_10 = arith.constant 0 : index
    %13 = vector.load %arg5[%c0_9, %c0_10] : memref<2x8xf32, #tpu.memory_space<vmem>>, vector<2x8xf32>
    tpu.vector_store %arg5[%c0_9, %c0_10], %12 {strides = array<i32>} : memref<2x8xf32, #tpu.memory_space<vmem>>, vector<2x8xf32>,
    return
  }
  func.func @transform_0(%arg0: i32, %arg1: i32) -> (i32, i32) {
    %c0_i32 = arith.constant 0 : i32
    %c0_i32_0 = arith.constant 0 : i32
    return %arg0, %c0_i32 : i32, i32
  }
  func.func @transform_1(%arg0: i32, %arg1: i32) -> (i32, i32) {
    %c0_i32 = arith.constant 0 : i32
    %c0_i32_0 = arith.constant 0 : i32
    %c0_i32_1 = arith.constant 0 : i32
    return %c0_i32, %c0_i32_0 : i32, i32
  }
  func.func @transform_2(%arg0: i32, %arg1: i32) -> (i32, i32, i32) {
    %c0_i32 = arith.constant 0 : i32
    %c0_i32_0 = arith.constant 0 : i32
    return %arg0, %arg1, %c0_i32 : i32, i32, i32
  }
  func.func @transform_3(%arg0: i32, %arg1: i32) -> (i32, i32) {
    %c0_i32 = arith.constant 0 : i32
    return %arg0, %arg1 : i32, i32
  }
}

</mosaic_0001>

<bundles_post_ra>
// kernel: tpu_custom_call.1
= control target key start
LH: loop header
LB: loop body
LE: loop exit
PB: predicated region body
PF: predicated region fallthrough
CT: control target
= control target key end

     0   :  { %8 = vsyncpa [#allocation3], 0  ;;  %s433_s0 = inlined_call_operand.hbm [shape: f32[2,32], index: 0, kind: input, shape index: {}]   ;;  %s434_s1 = inlined_call_operand.hbm [shape: f32[32,32], index: 1, kind: input, shape index: {}]   ;;  %s435_s2 = inlined_call_operand.hbm [shape: f32[2,8,32], index: 2, kind: input, shape index: {}]   ;;  %s436_s3 = inlined_call_operand.hbm [shape: f32[2,8], index: 3, kind: output, shape index: {}]  }
   0x1   :  { %9 = vsyncpa [#allocation6], 0 }
   0x2   :  { %10 = vsyncpa [#allocation4], 0  ;;  %s346_s12 = smov [#allocation5]   ;;  %s252_s16 = scalar_lea.hbm %s434_s1, 512 }
   0x3   :  { %s26_s13 = sshll.u32 %s346_s12, 4  ;;  %p253_p0 = scmp.ne.s32.totalorder %s434_s1, %s252_s16  ;;  %s27_s13 = int_to_ptr.vmem [resolvable:$true] %s26_s13 }
   0x4   :  { %p256_p1 = scmp.lt.u32.totalorder %s252_s16, %s434_s1 }
   0x6   :  { %p258_p2 = pnand %p256_p1, %p253_p0 }
   0x8   :  { %261 = shalt.err (!%p258_p2)
}
   0x9   :  { %s262_s21 = scalar_lea.vmem %s27_s13, 512  ;;  %p267_p4 = scmp.lt.s32.totalorder %s27_s13, %s27_s13 }
   0xa   :  { %p263_p3 = scmp.ne.s32.totalorder %s27_s13, %s262_s21  ;;  %p268_p5 = scmp.lt.s32.totalorder %s262_s21, %s262_s21 }
   0xc   :  { %p269_p6 = por %p268_p5, %p267_p4 }
   0xe   :  { %p270_p7 = pnand %p269_p6, %p263_p3 }
  0x10   :  { %273 = shalt.err (!%p270_p7)
}
  0x11   :  { %s347_s22 = smov 128   ;;  %s348_s23 = smov 8  }
  0x12   :  { %32 = dma.hbm_to_vmem [thread:$0]  %s434_s1, 512, %s27_s13, [#allocation6], %s347_s22, %s347_s22, %s348_s23  }
  0x13   :  { %s349_s26 = smov [#allocation2]   ;;  %s350_s28 = smov [#allocation7]  }
  0x14   :  { %s17_s27 = sshll.u32 %s349_s26, 4  ;;  %s38_s29 = sshll.u32 %s350_s28, 4  ;;  %s18_s27 = int_to_ptr.vmem [resolvable:$true] %s17_s27  ;;  %s39_s29 = int_to_ptr.vmem [resolvable:$true] %s38_s29 }
  0x15   :  { %s274_s5 = scalar_lea.hbm %s433_s0, 32 }
  0x16   :  { %p275_p8 = scmp.ne.s32.totalorder %s433_s0, %s274_s5  ;;  %p278_p9 = scmp.lt.u32.totalorder %s274_s5, %s433_s0 }
  0x18   :  { %p280_p10 = pnand %p278_p9, %p275_p8 }
  0x1a   :  { %283 = shalt.err (!%p280_p10)
}
  0x1b   :  { %s284_s1 = scalar_lea.vmem %s18_s27, 32  ;;  %p289_p12 = scmp.lt.s32.totalorder %s18_s27, %s18_s27 }
  0x1c   :  { %p285_p11 = scmp.ne.s32.totalorder %s18_s27, %s284_s1  ;;  %p290_p13 = scmp.lt.s32.totalorder %s284_s1, %s284_s1 }
  0x1e   :  { %p291_p0 = por %p290_p13, %p289_p12 }
  0x20   :  { %p292_p1 = pnand %p291_p0, %p285_p11 }
  0x22   :  { %295 = shalt.err (!%p292_p1)
}
  0x23   :  { %20 = dma.hbm_to_vmem [thread:$0]  %s433_s0, 32, %s18_s27, [#allocation3]  }
  0x24   :  { %s296_s14 = scalar_lea.hbm %s435_s2, 256 }
  0x25   :  { %p297_p2 = scmp.ne.s32.totalorder %s435_s2, %s296_s14  ;;  %p300_p3 = scmp.lt.u32.totalorder %s296_s14, %s435_s2 }
  0x27   :  { %p302_p4 = pnand %p300_p3, %p297_p2 }
  0x29   :  { %305 = shalt.err (!%p302_p4)
}
  0x2a   :  { %s306_s19 = scalar_lea.vmem %s39_s29, 256  ;;  %p311_p6 = scmp.lt.s32.totalorder %s39_s29, %s39_s29 }
  0x2b   :  { %p307_p5 = scmp.ne.s32.totalorder %s39_s29, %s306_s19  ;;  %p312_p7 = scmp.lt.s32.totalorder %s306_s19, %s306_s19 }
  0x2d   :  { %p313_p8 = por %p312_p7, %p311_p6 }
  0x2f   :  { %p314_p9 = pnand %p313_p8, %p307_p5 }
  0x31   :  { %317 = shalt.err (!%p314_p9)
}
  0x32   :  { %44 = dma.hbm_to_vmem [thread:$0]  %s435_s2, 256, %s39_s29, [#allocation6], %s347_s22, %s347_s22, %s348_s23  }
  0x33   :  { %340 = dma.done.wait [#allocation3], 32  }
  0x34   :  { %341 = vsyncadd [#allocation3], 4294967264 }
  0x35   :  { %342 = dma.done.wait [#allocation6], 768  }
  0x36   :  { %343 = vsyncadd [#allocation6], 4294966528  ;;  %v351_v0 = vmov 0.0|0.0   ;;  %vm352_vm0 = vmmov 0   ;;  %v353_v1 = vmov 0.0   ;;  %v57_v2 = vld [vmem:[#allocation5] sm:$0xff]  ;;  %v139_v9 = vlaneseq }
  0x37   :  { %232 = vmatprep.subr.bf16.mxu0 %v351_v0  ;;  %229 = vmatprep.mubr.msk.f32.mxu0 %vm352_vm0, %v353_v1  ;;  %v58_v3 = vld [vmem:[#allocation5 + $0x8] sm:$0xff]  ;;  %v59_v4 = vld [vmem:[#allocation5 + $0x10] sm:$0xff]  ;;  %v60_v6 = vld [vmem:[#allocation5 + $0x18] sm:$0xff]  ;;  %vm61_vm1 = vcmask 261120   ;;  %v354_v13 = vmov 1966171168  }
  0x38   :  { %v233_v5 = vpack.c.bf16 %v58_v3, %v57_v2  ;;  %v236_v7 = vpack.c.bf16 %v60_v6, %v59_v4  ;;  %v54_v8 = vld [vmem:[#allocation2] sm:$0x3]  ;;  %v140_v10 = vshrl.u32 %v139_v9, 7  ;;  %v185_v11 = vand.u32 127, %v139_v9  ;;  %v55_v23 = vld [vmem:[#allocation7] sm:$0xff]  ;;  %v56_v26 = vld [vmem:[#allocation7 + $0x8] sm:$0xff] }
  0x39   :  { %v137_v14 = vunpack.c.l.s4 %v354_v13  ;;  %s355_s2 = smov [#allocation8]   ;;  %vm194_vm2 = vcmask 1041409   ;;  %vm197_vm3 = vcmask 58368  }
  0x3a   :  { %234 = vmatpush3.bf16.msra.mxu0 %v233_v5  ;;  %v188_v12 = vsub.s32 %v185_v11, %v140_v10  ;;  %v160_v20 = vsub.s32 0, %v140_v10  ;;  %s205_s21 = sshll.u32 %s355_s2, 4  ;;  %s206_s21 = int_to_ptr.vmem [resolvable:$true] %s205_s21 }
  0x3b   :  { %235 = vmatprep.subr.bf16.mxu0 %v351_v0  ;;  %v138_v15 = vunpack.c.0.s8 %v137_v14  ;;  %s318_s22 = scalar_lea.vmem %s206_s21, 32  ;;  %p323_p11 = scmp.lt.s32.totalorder %s206_s21, %s206_s21 }
  0x3c   :  { %p319_p10 = scmp.ne.s32.totalorder %s206_s21, %s318_s22  ;;  %p324_p12 = scmp.lt.s32.totalorder %s318_s22, %s318_s22 }
  0x3d   :  { %v141_v16 = vsub.s32 %v138_v15, %v140_v10 }
  0x3e   :  { %237 = vmatpush3.bf16.msra.mxu0 %v236_v7  ;;  %p325_p13 = por %p324_p12, %p323_p11 }
  0x40   :  { %p326_p0 = pnand %p325_p13, %p319_p10 }
  0x41   :  { %230 = vmatmul.mubr.msk.f32.vlgmr.msra.gmra.mrb[0].mxu0 %vm61_vm1, %v54_v8 }
 0x114   :  { %v131_v17 = vpop.f32.mrb[0].mxu0 }
 0x115   :  { %v142_v18 = vrot.slane %v131_v17, %v141_v16  ;;  %v231_v19 = vpop.f32.mrb[1].mxu0 }
 0x117   :  { %v143_v21 = vcombine.high %v142_v18, %v142_v18  ;;  %v150_v22 = vrot.slane %v142_v18, %v141_v16 }
 0x119   :  { %v157_v24 = vrot.slane %v143_v21, %v141_v16  ;;  %v161_v25 = vrot.slane %v150_v22, %v160_v20 }
 0x11b   :  { %v168_v27 = vmul.f32 %v161_v25, %v55_v23  ;;  %v165_v28 = vrot.slane %v157_v24, %v160_v20 }
 0x11d   :  { %v170_v29 = vsel %vm61_vm1, %v168_v27, 0.0  ;;  %v169_v30 = vmul.f32 %v165_v28, %v56_v26 }
 0x11e   :  { %171 = vadd.xlane.f32.xlu0 %v170_v29 }
 0x11f   :  { %v173_v31 = vsel %vm61_vm1, %v169_v30, 0.0 }
 0x122   :  { %174 = vadd.xlane.f32.xlu0 %v173_v31 }
 0x1ab   :  { %v172_v32 = vpop.xlane.xlu0 %171 }
 0x1ac   :  { %v176_v33 = vmul.f32 0.17677669, %v172_v32 }
 0x1ae   :  { %248 = vtanh.f32 %v176_v33 }
 0x1af   :  { %v175_v34 = vpop.xlane.xlu0 %174 }
 0x1b0   :  { %v177_v35 = vmul.f32 0.17677669, %v175_v34 }
 0x1b2   :  { %250 = vtanh.f32 %v177_v35 }
 0x1b8   :  { %v249_v36 = vpop.eup %248 }
 0x1b9   :  { %v180_v37 = vmul.f32 10.0, %v249_v36 }
 0x1bb   :  { %v189_v40 = vrot.slane %v180_v37, %v188_v12 }
 0x1bc   :  { %v251_v38 = vpop.eup %250 }
 0x1bd   :  { %v181_v39 = vmul.f32 10.0, %v251_v38 }
 0x1bf   :  { %v193_v41 = vrot.slane %v181_v39, %v188_v12 }
 0x1c1   :  { %v195_v42 = vsel %vm194_vm2, %v193_v41, %v189_v40 }
 0x1c2   :  { %198 = vst.msk [vmem:[#allocation8] sm:$0x3] %vm197_vm3, %v195_v42 }
 0x1c3   :  { %329 = shalt.err (!%p326_p0)
}
 0x1c4   :  { %s330_s25 = scalar_lea.hbm %s436_s3, 32 }
 0x1c5   :  { %p331_p1 = scmp.ne.s32.totalorder %s436_s3, %s330_s25  ;;  %p334_p2 = scmp.lt.u32.totalorder %s330_s25, %s436_s3 }
 0x1c7   :  { %p336_p3 = pnand %p334_p2, %p331_p1 }
 0x1c9   :  { %339 = shalt.err (!%p336_p3)
}
 0x1ca   :  { %208 = dma.vmem_to_hbm [thread:$0]  %s206_s21, 32, %s436_s3, [#allocation4]  }
 0x1cb   :  { %344 = dma.done.wait [#allocation4], 32  }
 0x1cc   :  { %345 = vsyncadd [#allocation4], 4294967264 }
 0x1cd   :  { %212 = vsyncpa [#allocation3], 1 }
 0x1ce   :  { %213 = vsyncpa [#allocation6], 1 }
 0x1cf   :  { %214 = vsyncpa [#allocation4], 1 }

</bundles_post_ra>
